<compile_context>
chip_gen: v6e
topology: v6e:2x2x1
jax: 0.10.0
libtpu: 0.0.40
codegen_flags: <defaults>
</compile_context>

<pallas_src>
import jax
import jax.numpy as jnp
from jax.experimental import pallas as pl
from jax.experimental.pallas import tpu as pltpu

LANE = 128
DEFAULT_TILE_B = 8192   # amortizes ~0.35us/grid-step overhead; ~7 MiB VMEM at this size


def _round_up(n, m):
    return ((n + m - 1) // m) * m


def _pick_tile_b(b_pad, desired):
    """Largest multiple of 128 that divides b_pad and is <= desired; when possible,
    leave >= 2 grid steps so both TensorCores on v7x get work."""
    m = b_pad // LANE
    d_max = max(1, min(desired // LANE, m))
    if m >= 2:
        d_max = min(d_max, max(1, m // 2))
    for d in range(d_max, 0, -1):
        if m % d == 0:
            return LANE * d
    return LANE


def mlp_kernel(x_ref, w1_ref, b1_ref, w2_ref, b2_ref, w3_ref, b3_ref, o_ref):
    # x_ref: (2, tile_b); weights in (out, in) layout; biases as (out, 1) columns.
    x0 = x_ref[0:1, :]                                   # (1, tile_b)
    x1 = x_ref[1:2, :]                                   # (1, tile_b)
    # fc1 (K=2): two broadcast FMAs on the VPU.
    h1 = w1_ref[:, 0:1] * x0 + w1_ref[:, 1:2] * x1 + b1_ref[...]        # (64, tile_b)
    h1 = jnp.maximum(h1, 0.0)
    # fc2: (64, 64) @ (64, tile_b) on the MXU, f32 accumulation.
    h2 = jnp.dot(w2_ref[...], h1, preferred_element_type=jnp.float32) + b2_ref[...]
    h2 = jnp.maximum(h2, 0.0)                                            # (64, tile_b)
    # fc3: (1, 64) @ (64, tile_b) -> lane-dense (1, tile_b) output, unmasked store.
    o_ref[...] = jnp.dot(w3_ref[...], h2, preferred_element_type=jnp.float32) + b3_ref[...]


def mlp_forward(x, params, *, tile_b=DEFAULT_TILE_B):
    w1, b1, w2, b2, w3, b3 = params                      # W: (out, in), b: (out,)
    B = x.shape[0]

    b_pad = _round_up(max(B, 1), LANE)                   # pad only to lane granularity
    tile_b = _pick_tile_b(b_pad, tile_b)
    grid = (b_pad // tile_b,)

    # Batch-in-lanes input: (2, B_pad). Padded columns produce garbage, sliced off below.
    xt = jnp.pad(x.astype(jnp.float32).T, ((0, 0), (0, b_pad - B)))

    b1c = b1.reshape(64, 1)
    b2c = b2.reshape(64, 1)
    b3c = b3.reshape(1, 1)

    const = lambda a: pl.BlockSpec(a.shape, lambda i: (0, 0))

    weight_bytes = sum(int(a.size) * a.dtype.itemsize
                       for a in (w1, b1c, w2, b2c, w3, b3c))
    cost = pl.CostEstimate(
        flops=2 * b_pad * (2 * 64 + 64 * 64 + 64 * 1),
        transcendentals=0,
        bytes_accessed=b_pad * (2 + 1) * 4 + weight_bytes,
    )

    out = pl.pallas_call(
        mlp_kernel,
        out_shape=jax.ShapeDtypeStruct((1, b_pad), jnp.float32),
        grid=grid,
        in_specs=[
            pl.BlockSpec((2, tile_b), lambda i: (0, i)),  # batch-tiled activations
            const(w1), const(b1c),                        # weights/biases VMEM-resident
            const(w2), const(b2c),
            const(w3), const(b3c),
        ],
        out_specs=pl.BlockSpec((1, tile_b), lambda i: (0, i)),
        compiler_params=pltpu.CompilerParams(
            dimension_semantics=("parallel",),            # shard batch across TCs on v7x
        ),
        cost_estimate=cost,
    )(xt, w1, b1c, w2, b2c, w3, b3c)

    return out[0, :B].reshape(B, 1)


def init_params(key):
    # Deterministic init mimicking nn.Linear's uniform(-1/sqrt(fan_in), 1/sqrt(fan_in)),
    # stored in nn.Linear's native (out_features, in_features) layout.
    k1, k2, k3, k4, k5, k6 = jax.random.split(key, 6)

    def lin(kw, kb, fan_in, fan_out):
        bound = 1.0 / float(jnp.sqrt(jnp.float32(fan_in)))
        w = jax.random.uniform(kw, (fan_out, fan_in), jnp.float32, -bound, bound)
        b = jax.random.uniform(kb, (fan_out,), jnp.float32, -bound, bound)
        return w, b

    w1, b1 = lin(k1, k2, 2, 64)
    w2, b2 = lin(k3, k4, 64, 64)
    w3, b3 = lin(k5, k6, 64, 1)
    return (w1, b1, w2, b2, w3, b3)


def _reference(x, params):
    w1, b1, w2, b2, w3, b3 = params
    h = jnp.maximum(x @ w1.T + b1, 0.0)
    h = jnp.maximum(h @ w2.T + b2, 0.0)
    return h @ w3.T + b3


if __name__ == "__main__":
    key = jax.random.PRNGKey(0)
    kx, kx2, kp = jax.random.split(key, 3)
    params = init_params(kp)

    # Small-batch check (single tile).
    B = 8
    x = jax.random.normal(kx, (B, 2), jnp.float32)
    out = mlp_forward(x, params)
    jax.block_until_ready(out)
    assert out.shape == (B, 1)
    assert jnp.allclose(out, _reference(x, params), atol=1e-4, rtol=1e-5)

    # Multi-tile check (exercises the batch grid + lane padding/slicing path).
    B2 = 300
    x2 = jax.random.normal(kx2, (B2, 2), jnp.float32)
    out2 = mlp_forward(x2, params)
    jax.block_until_ready(out2)
    assert out2.shape == (B2, 1)
    assert jnp.allclose(out2, _reference(x2, params), atol=1e-4, rtol=1e-5)

    print("KERNEL_OK")
</pallas_src>

<mosaic_0001>
module attributes {stable_mosaic.version = 11 : i64} {
  func.func @mlp_kernel(%arg0: i32, %arg1: memref<2x128xf32, #tpu.memory_space<vmem>>, %arg2: memref<64x2xf32, #tpu.memory_space<vmem>>, %arg3: memref<64x1xf32, #tpu.memory_space<vmem>>, %arg4: memref<64x64xf32, #tpu.memory_space<vmem>>, %arg5: memref<64x1xf32, #tpu.memory_space<vmem>>, %arg6: memref<1x64xf32, #tpu.memory_space<vmem>>, %arg7: memref<1x1xf32, #tpu.memory_space<vmem>>, %arg8: memref<1x128xf32, #tpu.memory_space<vmem>>) attributes {dimension_semantics = [#tpu.dimension_semantics<parallel>], iteration_bounds = array<i64: 1>, scalar_prefetch = 0 : i64, scratch_operands = 0 : i64, tpu.core_type = #tpu.core_type<tc>, window_params = [{transform_indices = @transform_0, window_bounds = array<i64: 2, 128>}, {pipeline_mode = #tpu.pipeline_mode<synchronous>, transform_indices = @transform_1, window_bounds = array<i64: 64, 2>}, {pipeline_mode = #tpu.pipeline_mode<synchronous>, transform_indices = @transform_2, window_bounds = array<i64: 64, 1>}, {pipeline_mode = #tpu.pipeline_mode<synchronous>, transform_indices = @transform_3, window_bounds = array<i64: 64, 64>}, {pipeline_mode = #tpu.pipeline_mode<synchronous>, transform_indices = @transform_4, window_bounds = array<i64: 64, 1>}, {pipeline_mode = #tpu.pipeline_mode<synchronous>, transform_indices = @transform_5, window_bounds = array<i64: 1, 64>}, {pipeline_mode = #tpu.pipeline_mode<synchronous>, transform_indices = @transform_6, window_bounds = array<i64: 1, 1>}, {transform_indices = @transform_7, window_bounds = array<i64: 1, 128>}]} {
    %c0 = arith.constant 0 : index
    %c0_0 = arith.constant 0 : index
    %0 = vector.load %arg1[%c0, %c0_0] : memref<2x128xf32, #tpu.memory_space<vmem>>, vector<1x128xf32>
    %c1 = arith.constant 1 : index
    %c0_1 = arith.constant 0 : index
    %1 = vector.load %arg1[%c1, %c0_1] : memref<2x128xf32, #tpu.memory_space<vmem>>, vector<1x128xf32>
    %c0_2 = arith.constant 0 : index
    %c0_3 = arith.constant 0 : index
    %2 = vector.load %arg2[%c0_2, %c0_3] : memref<64x2xf32, #tpu.memory_space<vmem>>, vector<64x1xf32>
    %3 = vector.broadcast %2 : vector<64x1xf32> to vector<64x128xf32>
    %4 = vector.broadcast %0 : vector<1x128xf32> to vector<64x128xf32>
    %5 = arith.mulf %3, %4 : vector<64x128xf32>
    %c0_4 = arith.constant 0 : index
    %c1_5 = arith.constant 1 : index
    %6 = vector.load %arg2[%c0_4, %c1_5] : memref<64x2xf32, #tpu.memory_space<vmem>>, vector<64x1xf32>
    %7 = vector.broadcast %6 : vector<64x1xf32> to vector<64x128xf32>
    %8 = vector.broadcast %1 : vector<1x128xf32> to vector<64x128xf32>
    %9 = arith.mulf %7, %8 : vector<64x128xf32>
    %10 = arith.addf %5, %9 : vector<64x128xf32>
    %c0_6 = arith.constant 0 : index
    %c0_7 = arith.constant 0 : index
    %11 = vector.load %arg3[%c0_6, %c0_7] : memref<64x1xf32, #tpu.memory_space<vmem>>, vector<64x1xf32>
    %12 = vector.broadcast %11 : vector<64x1xf32> to vector<64x128xf32>
    %13 = arith.addf %10, %12 : vector<64x128xf32>
    %cst = arith.constant 0.000000e+00 : f32
    %14 = vector.broadcast %cst : f32 to vector<64x128xf32>
    %15 = arith.maximumf %13, %14 : vector<64x128xf32>
    %c0_8 = arith.constant 0 : index
    %c0_9 = arith.constant 0 : index
    %16 = vector.load %arg4[%c0_8, %c0_9] : memref<64x64xf32, #tpu.memory_space<vmem>>, vector<64x64xf32>
    %cst_10 = arith.constant dense<0.000000e+00> : vector<64x128xf32>
    %17 = tpu.matmul %16, %15, %cst_10 {dimension_numbers = #tpu.dot_dimension_numbers<[1], [0], [0], [1], [0, 0, 1, 1], [], []>} : vector<64x64xf32>, vector<64x128xf32>, vector<64x128xf32> -> vector<64x128xf32>
    %c0_11 = arith.constant 0 : index
    %c0_12 = arith.constant 0 : index
    %18 = vector.load %arg5[%c0_11, %c0_12] : memref<64x1xf32, #tpu.memory_space<vmem>>, vector<64x1xf32>
    %19 = vector.broadcast %18 : vector<64x1xf32> to vector<64x128xf32>
    %20 = arith.addf %17, %19 : vector<64x128xf32>
    %cst_13 = arith.constant 0.000000e+00 : f32
    %21 = vector.broadcast %cst_13 : f32 to vector<64x128xf32>
    %22 = arith.maximumf %20, %21 : vector<64x128xf32>
    %c0_14 = arith.constant 0 : index
    %c0_15 = arith.constant 0 : index
    %23 = vector.load %arg6[%c0_14, %c0_15] : memref<1x64xf32, #tpu.memory_space<vmem>>, vector<1x64xf32>
    %cst_16 = arith.constant dense<0.000000e+00> : vector<1x128xf32>
    %24 = tpu.matmul %23, %22, %cst_16 {dimension_numbers = #tpu.dot_dimension_numbers<[1], [0], [0], [1], [0, 0, 1, 1], [], []>} : vector<1x64xf32>, vector<64x128xf32>, vector<1x128xf32> -> vector<1x128xf32>
    %c0_17 = arith.constant 0 : index
    %c0_18 = arith.constant 0 : index
    %25 = vector.load %arg7[%c0_17, %c0_18] : memref<1x1xf32, #tpu.memory_space<vmem>>, vector<1x1xf32>
    %26 = vector.broadcast %25 : vector<1x1xf32> to vector<1x128xf32>
    %27 = arith.addf %24, %26 : vector<1x128xf32>
    %c0_19 = arith.constant 0 : index
    %c0_20 = arith.constant 0 : index
    %28 = vector.load %arg8[%c0_19, %c0_20] : memref<1x128xf32, #tpu.memory_space<vmem>>, vector<1x128xf32>
    tpu.vector_store %arg8[%c0_19, %c0_20], %27 {strides = array<i32>} : memref<1x128xf32, #tpu.memory_space<vmem>>, vector<1x128xf32>,
    return
  }
  func.func @transform_0(%arg0: i32) -> (i32, i32) {
    %c0_i32 = arith.constant 0 : i32
    %c0_i32_0 = arith.constant 0 : i32
    return %c0_i32, %arg0 : i32, i32
  }
  func.func @transform_1(%arg0: i32) -> (i32, i32) {
    %c0_i32 = arith.constant 0 : i32
    %c0_i32_0 = arith.constant 0 : i32
    %c0_i32_1 = arith.constant 0 : i32
    return %c0_i32, %c0_i32_0 : i32, i32
  }
  func.func @transform_2(%arg0: i32) -> (i32, i32) {
    %c0_i32 = arith.constant 0 : i32
    %c0_i32_0 = arith.constant 0 : i32
    %c0_i32_1 = arith.constant 0 : i32
    return %c0_i32, %c0_i32_0 : i32, i32
  }
  func.func @transform_3(%arg0: i32) -> (i32, i32) {
    %c0_i32 = arith.constant 0 : i32
    %c0_i32_0 = arith.constant 0 : i32
    %c0_i32_1 = arith.constant 0 : i32
    return %c0_i32, %c0_i32_0 : i32, i32
  }
  func.func @transform_4(%arg0: i32) -> (i32, i32) {
    %c0_i32 = arith.constant 0 : i32
    %c0_i32_0 = arith.constant 0 : i32
    %c0_i32_1 = arith.constant 0 : i32
    return %c0_i32, %c0_i32_0 : i32, i32
  }
  func.func @transform_5(%arg0: i32) -> (i32, i32) {
    %c0_i32 = arith.constant 0 : i32
    %c0_i32_0 = arith.constant 0 : i32
    %c0_i32_1 = arith.constant 0 : i32
    return %c0_i32, %c0_i32_0 : i32, i32
  }
  func.func @transform_6(%arg0: i32) -> (i32, i32) {
    %c0_i32 = arith.constant 0 : i32
    %c0_i32_0 = arith.constant 0 : i32
    %c0_i32_1 = arith.constant 0 : i32
    return %c0_i32, %c0_i32_0 : i32, i32
  }
  func.func @transform_7(%arg0: i32) -> (i32, i32) {
    %c0_i32 = arith.constant 0 : i32
    %c0_i32_0 = arith.constant 0 : i32
    return %c0_i32, %arg0 : i32, i32
  }
}

</mosaic_0001>

<bundles_post_ra>
// kernel: tpu_custom_call.1
= control target key start
LH: loop header
LB: loop body
LE: loop exit
PB: predicated region body
PF: predicated region fallthrough
CT: control target
= control target key end

     0   :  { %s786_s0 = inlined_call_operand.vmem [shape: f32[2,128], index: 0, kind: input, shape index: {}]   ;;  %s787_s1 = inlined_call_operand.vmem [shape: f32[64,2], index: 1, kind: input, shape index: {}]   ;;  %s788_s2 = inlined_call_operand.vmem [shape: f32[64,1], index: 2, kind: input, shape index: {}]   ;;  %s789_s3 = inlined_call_operand.vmem [shape: f32[64,64], index: 3, kind: input, shape index: {}]   ;;  %s790_s4 = inlined_call_operand.vmem [shape: f32[64,1], index: 4, kind: input, shape index: {}]   ;;  %s791_s5 = inlined_call_operand.vmem [shape: f32[1,64], index: 5, kind: input, shape index: {}]   ;;  %s792_s6 = inlined_call_operand.<no memory space> [shape: f32[1,1], index: 6, kind: input, shape index: {}]   ;;  %s793_s7 = inlined_call_operand.hbm [shape: f32[1,128], index: 7, kind: output, shape index: {}]  }
   0x1   :  { %v12_v0 = vstv %s792_s6 }
   0x2   :  { %13 = vst [vmem:[#allocation2] sm:$0x1] %v12_v0 }
   0x3   :  { %v38_v1 = vld [vmem:[%s787_s1 + $0x38] sm:$0xff]  ;;  %v37_v2 = vld [vmem:[%s787_s1 + $0x30] sm:$0xff]  ;;  %v621_v3 = vmov 1   ;;  %v622_v4 = vmov 0   ;;  %v36_v5 = vld [vmem:[%s787_s1 + $0x28] sm:$0xff] }
   0x4   :  { %588 = vset.pattern.permute.xlu0 %v621_v3  ;;  %589 = vset.pattern.permute.xlu1 %v622_v4  ;;  %v33_v6 = vld [vmem:[%s787_s1 + $0x10] sm:$0xff] }
   0x5   :  { %120 = vperm.xlu0 %588, %v38_v1   ;;  %71 = vperm.xlu1 %589, %v37_v2  }
   0x9   :  { %590 = vset.pattern.permute.xlu1 %v621_v3  ;;  %112 = vperm.xlu0 %588, %v36_v5  }
   0xa   :  { %116 = vperm.xlu1 %590, %v37_v2  }
   0xb   :  { %14 = vsyncpa [#allocation4], 0  ;;  %v32_v7 = vld [vmem:[%s787_s1 + $0x8] sm:$0xff]  ;;  %v150_v8 = vld [vmem:[%s788_s2 + $0x38] sm:$0xff]  ;;  %vm263_vm0 = vcmask 523264   ;;  %vm624_vm1 = vmmov 0  }
   0xc   :  { %v35_v9 = vld [vmem:[%s787_s1 + $0x20] sm:$0xff]  ;;  %v149_v10 = vld [vmem:[%s788_s2 + $0x30] sm:$0xff]  ;;  %v34_v11 = vld [vmem:[%s787_s1 + $0x18] sm:$0xff]  ;;  %s625_s18 = smov [#allocation3]  }
   0xd   :  { %100 = vperm.xlu0 %588, %v33_v6   ;;  %v148_v12 = vld [vmem:[%s788_s2 + $0x28] sm:$0xff]  ;;  %v31_v13 = vld [vmem:[%s787_s1] sm:$0xff]  ;;  %v222_v16 = vld [vmem:[%s790_s4 + $0x38] sm:$0xff]  ;;  %s492_s19 = sshll.u32 %s625_s18, 4  ;;  %s493_s19 = int_to_ptr.vmem [resolvable:$true] %s492_s19 }
   0xe   :  { %591 = vset.pattern.permute.xlu1 %v622_v4  ;;  %v144_v14 = vld [vmem:[%s788_s2 + $0x8] sm:$0xff]  ;;  %v147_v15 = vld [vmem:[%s788_s2 + $0x20] sm:$0xff]  ;;  %v146_v18 = vld [vmem:[%s788_s2 + $0x18] sm:$0xff]  ;;  %s599_s20 = scalar_lea.vmem %s493_s19, 16  ;;  %s603_s21 = scalar_lea.vmem %s493_s19, 32 }
   0xf   :  { %66 = vperm.xlu1 %591, %v36_v5   ;;  %v220_v17 = vld [vmem:[%s790_s4 + $0x28] sm:$0xff]  ;;  %v218_v19 = vld [vmem:[%s790_s4 + $0x18] sm:$0xff]  ;;  %v145_v21 = vld [vmem:[%s788_s2 + $0x10] sm:$0xff]  ;;  %p600_p0 = scmp.ne.s32.totalorder %s493_s19, %s599_s20  ;;  %p604_p1 = scmp.lt.s32.totalorder %s493_s19, %s493_s19 }
  0x10   :  { %v216_v20 = vld [vmem:[%s790_s4 + $0x8] sm:$0xff]  ;;  %v402_v22 = vld [vmem:[#allocation2] sm:$0x1]  ;;  %v221_v25 = vld [vmem:[%s790_s4 + $0x30] sm:$0xff]  ;;  %p605_p2 = scmp.lt.s32.totalorder %s603_s21, %s599_s20 }
  0x11   :  { %96 = vperm.xlu0 %588, %v32_v7   ;;  %v143_v23 = vld [vmem:[%s788_s2] sm:$0xff]  ;;  %v217_v27 = vld [vmem:[%s790_s4 + $0x10] sm:$0xff] }
  0x12   :  { %v207_v24 = vld [vmem:[%s789_s3] sm:$0xff]  ;;  %p606_p3 = por %p605_p2, %p604_p1 }
  0x13   :  { %188 = vperm.xlu1 %591, %v150_v8   ;;  %552 = vmatprep.mubr.msk.f32.mxu0 %vm263_vm0, %v207_v24  ;;  %v219_v26 = vld [vmem:[%s790_s4 + $0x20] sm:$0xff] }
  0x14   :  { %v215_v28 = vld [vmem:[%s790_s4] sm:$0xff]  ;;  %p607_p4 = pnand %p606_p3, %p600_p0 }
  0x15   :  { %596 = vset.pattern.permute.xlu0 %v622_v4  ;;  %v501_v37 = vld [vmem:[%s786_s0 + $0x1] ss:$0 sm:$0xff]  ;;  %v500_v39 = vld [vmem:[%s786_s0] ss:$0 sm:$0xff] }
  0x16   :  { %76 = vperm.xlu0 %596, %v38_v1  }
  0x17   :  { %592 = vset.pattern.permute.xlu1 %v621_v3 }
  0x18   :  { %108 = vperm.xlu1 %592, %v35_v9  }
  0x1a   :  { %61 = vperm.xlu0 %596, %v35_v9  }
  0x1c   :  { %593 = vset.pattern.permute.xlu1 %v622_v4 }
  0x1d   :  { %183 = vperm.xlu1 %593, %v149_v10  }
  0x1e   :  { %56 = vperm.xlu0 %596, %v34_v11  }
  0x21   :  { %594 = vset.pattern.permute.xlu1 %v621_v3 }
  0x22   :  { %104 = vperm.xlu1 %594, %v34_v11   ;;  %178 = vperm.xlu0 %596, %v148_v12  }
  0x26   :  { %595 = vset.pattern.permute.xlu1 %v622_v4  ;;  %41 = vperm.xlu0 %596, %v31_v13  }
  0x27   :  { %51 = vperm.xlu1 %595, %v33_v6  }
  0x2a   :  { %158 = vperm.xlu0 %596, %v144_v14  }
  0x2b   :  { %173 = vperm.xlu1 %595, %v147_v15  }
  0x2e   :  { %260 = vperm.xlu0 %596, %v222_v16  }
  0x2f   :  { %46 = vperm.xlu1 %595, %v32_v7  }
  0x32   :  { %250 = vperm.xlu0 %596, %v220_v17  }
  0x33   :  { %168 = vperm.xlu1 %595, %v146_v18  }
  0x36   :  { %240 = vperm.xlu0 %596, %v218_v19  }
  0x37   :  { %597 = vset.pattern.permute.xlu1 %v621_v3 }
  0x38   :  { %92 = vperm.xlu1 %597, %v31_v13  }
  0x3a   :  { %230 = vperm.xlu0 %596, %v216_v20  }
  0x3c   :  { %598 = vset.pattern.permute.xlu1 %v622_v4 }
  0x3d   :  { %163 = vperm.xlu1 %598, %v145_v21  }
  0x3e   :  { %405 = vperm.xlu0 %596, %v402_v22  }
  0x41   :  { %153 = vperm.xlu1 %598, %v143_v23  }
  0x45   :  { %255 = vperm.xlu1 %598, %v221_v25  }
  0x49   :  { %245 = vperm.xlu1 %598, %v219_v26  }
  0x4d   :  { %235 = vperm.xlu1 %598, %v217_v27  }
  0x51   :  { %225 = vperm.xlu1 %598, %v215_v28  }
  0x80   :  { %v72_v29 = vpop.permute.xlu1 %71  ;;  %v121_v30 = vpop.permute.xlu0 %120 }
  0x81   :  { %v134_v38 = vmul.f32 %v501_v37, %v121_v30  ;;  %v89_v45 = vmul.f32 %v500_v39, %v72_v29 }
  0x84   :  { %v113_v31 = vpop.permute.xlu0 %112 }
  0x85   :  { %v117_v32 = vpop.permute.xlu1 %116  ;;  %v132_v49 = vmul.f32 %v501_v37, %v113_v31  ;;  %v208_v31 = vld [vmem:[%s789_s3 + $0x8] sm:$0xff] }
  0x86   :  { %v133_v42 = vmul.f32 %v501_v37, %v117_v32  ;;  %v209_v32 = vld [vmem:[%s789_s3 + $0x10] sm:$0xff] }
  0x88   :  { %v101_v33 = vpop.permute.xlu0 %100  ;;  %v141_v48 = vadd.f32 %v133_v42, %v89_v45 }
  0x89   :  { %v129_v16 = vmul.f32 %v501_v37, %v101_v33  ;;  %v210_v33 = vld [vmem:[%s789_s3 + $0x18] sm:$0xff] }
  0x8a   :  { %v67_v34 = vpop.permute.xlu1 %66 }
  0x8b   :  { %v88_v50 = vmul.f32 %v500_v39, %v67_v34  ;;  %v211_v34 = vld [vmem:[%s789_s3 + $0x20] sm:$0xff] }
  0x8c   :  { %v97_v35 = vpop.permute.xlu0 %96 }
  0x8d   :  { %v140_v56 = vadd.f32 %v132_v49, %v88_v50  ;;  %v128_v13 = vmul.f32 %v501_v37, %v97_v35  ;;  %v212_v35 = vld [vmem:[%s789_s3 + $0x28] sm:$0xff] }
  0x8e   :  { %v189_v36 = vpop.permute.xlu1 %188 }
  0x91   :  { %v77_v40 = vpop.permute.xlu0 %76 }
  0x92   :  { %v90_v41 = vmul.f32 %v500_v39, %v77_v40 }
  0x93   :  { %v109_v43 = vpop.permute.xlu1 %108 }
  0x94   :  { %v142_v44 = vadd.f32 %v134_v38, %v90_v41  ;;  %v131_v63 = vmul.f32 %v501_v37, %v109_v43  ;;  %v623_v38 = vmov 0.0  }
  0x95   :  { %v62_v46 = vpop.permute.xlu0 %61  ;;  %564 = vmatprep.subr.mxu1 %v623_v38  ;;  %580 = vmatprep.mubr.msk.f32.mxu1 %vm624_vm1, %v623_v38 }
  0x96   :  { %v198_v47 = vadd.f32 %v189_v36, %v142_v44  ;;  %v87_v61 = vmul.f32 %v500_v39, %v62_v46  ;;  %v213_v36 = vld [vmem:[%s789_s3 + $0x30] sm:$0xff] }
  0x98   :  { %v184_v51 = vpop.permute.xlu1 %183  ;;  %v206_v52 = vmax.f32 %v198_v47, 0.0  ;;  %v139_v0 = vadd.f32 %v131_v63, %v87_v61 }
  0x99   :  { %v197_v53 = vadd.f32 %v184_v51, %v141_v48  ;;  %v57_v54 = vpop.permute.xlu0 %56 }
  0x9a   :  { %536 = vmatprep.subr.mxu0 %v206_v52  ;;  %v86_v3 = vmul.f32 %v500_v39, %v57_v54 }
  0x9b   :  { %v205_v55 = vmax.f32 %v197_v53, 0.0  ;;  %537 = vmatpush3.msra.mxu0 %v206_v52 }
  0x9d   :  { %v105_v57 = vpop.permute.xlu1 %104  ;;  %v179_v58 = vpop.permute.xlu0 %178  ;;  %538 = vmatprep.subr.mxu0 %v205_v55 }
  0x9e   :  { %v196_v59 = vadd.f32 %v179_v58, %v140_v56  ;;  %539 = vmatpush3.msra.mxu0 %v205_v55  ;;  %v130_v4 = vmul.f32 %v501_v37, %v105_v57 }
  0xa0   :  { %v204_v60 = vmax.f32 %v196_v59, 0.0  ;;  %v138_v7 = vadd.f32 %v130_v4, %v86_v3 }
  0xa1   :  { %v42_v12 = vpop.permute.xlu0 %41 }
  0xa2   :  { %v52_v62 = vpop.permute.xlu1 %51  ;;  %540 = vmatprep.subr.mxu0 %v204_v60  ;;  %v83_v22 = vmul.f32 %v500_v39, %v42_v12 }
  0xa3   :  { %541 = vmatpush3.msra.mxu0 %v204_v60  ;;  %v85_v14 = vmul.f32 %v500_v39, %v52_v62 }
  0xa5   :  { %v137_v19 = vadd.f32 %v129_v16, %v85_v14  ;;  %v159_v20 = vpop.permute.xlu0 %158 }
  0xa6   :  { %v174_v1 = vpop.permute.xlu1 %173 }
  0xa7   :  { %v195_v2 = vadd.f32 %v174_v1, %v139_v0 }
  0xa9   :  { %v203_v5 = vmax.f32 %v195_v2, 0.0  ;;  %v261_v41 = vpop.permute.xlu0 %260 }
  0xaa   :  { %v47_v6 = vpop.permute.xlu1 %46 }
  0xab   :  { %542 = vmatprep.subr.mxu0 %v203_v5  ;;  %v84_v10 = vmul.f32 %v500_v39, %v47_v6 }
  0xac   :  { %543 = vmatpush3.msra.mxu0 %v203_v5 }
  0xad   :  { %v136_v17 = vadd.f32 %v128_v13, %v84_v10  ;;  %v251_v46 = vpop.permute.xlu0 %250 }
  0xae   :  { %v169_v8 = vpop.permute.xlu1 %168 }
  0xaf   :  { %v194_v9 = vadd.f32 %v169_v8, %v138_v7  ;;  %v192_v24 = vadd.f32 %v159_v20, %v136_v17  ;;  %v401_v7 = vld [vmem:[%s791_s5] sm:$0x1]  ;;  %v408_v8 = vlaneseq }
  0xb1   :  { %v202_v11 = vmax.f32 %v194_v9, 0.0  ;;  %v200_v29 = vmax.f32 %v192_v24, 0.0  ;;  %v241_v55 = vpop.permute.xlu0 %240  ;;  %v409_v9 = vshrl.u32 %v408_v8, 7 }
  0xb3   :  { %v93_v15 = vpop.permute.xlu1 %92  ;;  %544 = vmatprep.subr.mxu0 %v202_v11  ;;  %v410_v10 = vsub.s32 0, %v409_v9 }
  0xb4   :  { %545 = vmatpush3.msra.mxu0 %v202_v11  ;;  %v127_v18 = vmul.f32 %v501_v37, %v93_v15  ;;  %v214_v37 = vld [vmem:[%s789_s3 + $0x38] sm:$0xff] }
  0xb5   :  { %v231_v63 = vpop.permute.xlu0 %230 }
  0xb6   :  { %v135_v26 = vadd.f32 %v127_v18, %v83_v22 }
  0xb8   :  { %v164_v21 = vpop.permute.xlu1 %163 }
  0xb9   :  { %v193_v23 = vadd.f32 %v164_v21, %v137_v19  ;;  %v406_v11 = vpop.permute.xlu0 %405 }
  0xba   :  { %v411_v12 = vrot.slane %v406_v11, %v410_v10 }
  0xbb   :  { %v201_v25 = vmax.f32 %v193_v23, 0.0 }
  0xbc   :  { %v154_v27 = vpop.permute.xlu1 %153 }
  0xbd   :  { %v191_v28 = vadd.f32 %v154_v27, %v135_v26  ;;  %546 = vmatprep.subr.mxu0 %v201_v25 }
  0xbe   :  { %547 = vmatpush3.msra.mxu0 %v201_v25 }
  0xbf   :  { %v199_v30 = vmax.f32 %v191_v28, 0.0  ;;  %548 = vmatprep.subr.mxu0 %v200_v29 }
  0xc0   :  { %549 = vmatpush3.msra.mxu0 %v200_v29  ;;  %v256_v43 = vpop.permute.xlu1 %255 }
  0xc1   :  { %550 = vmatprep.subr.mxu0 %v199_v30 }
  0xc2   :  { %551 = vmatpush3.msra.mxu0 %v199_v30 }
  0xc3   :  { %553 = vmatmul.mubr.msk.f32.vlgmr.msra.gmra.mxu0 %vm263_vm0, %v208_v31 }
  0xc4   :  { %555 = vmatprep.mubr.msk.f32.mxu0 %vm263_vm0, %v209_v32  ;;  %v246_v48 = vpop.permute.xlu1 %245 }
  0xc7   :  { %556 = vmatmul.mubr.msk.f32.gmra.mxu0 %vm263_vm0, %v210_v33 }
  0xc8   :  { %558 = vmatprep.mubr.msk.f32.mxu0 %vm263_vm0, %v211_v34  ;;  %v236_v58 = vpop.permute.xlu1 %235 }
  0xcb   :  { %559 = vmatmul.mubr.msk.f32.gmra.mxu0 %vm263_vm0, %v212_v35 }
  0xcc   :  { %561 = vmatprep.mubr.msk.f32.mxu0 %vm263_vm0, %v213_v36  ;;  %v226_v2 = vpop.permute.xlu1 %225 }
  0xcf   :  { %562 = vmatmul.mubr.msk.f32.gmra.mxu0 %vm263_vm0, %v214_v37 }
 0x183   :  { %v554_v39 = vpop.f32.mrf.mxu0 }
 0x184   :  { %v360_v0 = vadd.f32 %v554_v39, %v231_v63 }
 0x185   :  { %v354_v40 = vpop.f32.mrf.mxu0 }
 0x186   :  { %v355_v3 = vadd.f32 %v354_v40, %v226_v2  ;;  %v394_v5 = vmax.f32 %v360_v0, 0.0 }
 0x187   :  { %v557_v42 = vpop.f32.mrf.mxu0 }
 0x188   :  { %v370_v59 = vadd.f32 %v557_v42, %v241_v55  ;;  %v393_v6 = vmax.f32 %v355_v3, 0.0 }
 0x189   :  { %v364_v44 = vpop.f32.mrf.mxu0 }
 0x18a   :  { %v365_v61 = vadd.f32 %v364_v44, %v236_v58  ;;  %v396_v1 = vmax.f32 %v370_v59, 0.0 }
 0x18b   :  { %v560_v45 = vpop.f32.mrf.mxu0 }
 0x18c   :  { %v380_v52 = vadd.f32 %v560_v45, %v251_v46  ;;  %v395_v4 = vmax.f32 %v365_v61, 0.0 }
 0x18d   :  { %v374_v47 = vpop.f32.mrf.mxu0 }
 0x18e   :  { %v375_v56 = vadd.f32 %v374_v47, %v246_v48  ;;  %v398_v60 = vmax.f32 %v380_v52, 0.0 }
 0x18f   :  { %v563_v49 = vpop.f32.mrf.mxu0 }
 0x190   :  { %v390_v50 = vadd.f32 %v563_v49, %v261_v41  ;;  %v397_v62 = vmax.f32 %v375_v56, 0.0 }
 0x191   :  { %v384_v51 = vpop.f32.mrf.mxu0 }
 0x192   :  { %v400_v53 = vmax.f32 %v390_v50, 0.0  ;;  %v385_v54 = vadd.f32 %v384_v51, %v256_v43 }
 0x194   :  { %v399_v57 = vmax.f32 %v385_v54, 0.0  ;;  %565 = vmatpush3.msra.mxu1 %v400_v53 }
 0x195   :  { %566 = vmatprep.subr.mxu1 %v623_v38 }
 0x196   :  { %567 = vmatpush3.msra.mxu1 %v399_v57 }
 0x197   :  { %568 = vmatprep.subr.mxu1 %v623_v38 }
 0x198   :  { %569 = vmatpush3.msra.mxu1 %v398_v60 }
 0x199   :  { %570 = vmatprep.subr.mxu1 %v623_v38 }
 0x19a   :  { %571 = vmatpush3.msra.mxu1 %v397_v62 }
 0x19b   :  { %572 = vmatprep.subr.mxu1 %v623_v38 }
 0x19c   :  { %573 = vmatpush3.msra.mxu1 %v396_v1 }
 0x19d   :  { %574 = vmatprep.subr.mxu1 %v623_v38 }
 0x19e   :  { %575 = vmatpush3.msra.mxu1 %v395_v4 }
 0x19f   :  { %576 = vmatprep.subr.mxu1 %v623_v38 }
 0x1a0   :  { %577 = vmatpush3.msra.mxu1 %v394_v5 }
 0x1a1   :  { %578 = vmatprep.subr.mxu1 %v623_v38 }
 0x1a2   :  { %579 = vmatpush3.msra.mxu1 %v393_v6 }
 0x1a3   :  { %581 = vmatmul.mubr.msk.f32.vlgmr.msra.gmra.mxu1 %vm263_vm0, %v401_v7 }
 0x263   :  { %v481_v13 = vpop.f32.mrf.mxu1 }
 0x264   :  { %v482_v14 = vadd.f32 %v481_v13, %v411_v12 }
 0x265   :  { %v582_v15 = vpop.f32.mrf.mxu1 }
 0x266   :  { %485 = vst [vmem:[#allocation3] sm:$0x1] %v482_v14 }
 0x267   :  { %610 = shalt.err (!%p607_p4)
}
 0x268   :  { %495 = dma.vmem_to_hbm [thread:$0]  %s493_s19, 16, %s793_s7, [#allocation4]  }
 0x269   :  { %619 = dma.done.wait [#allocation4], 16  }
 0x26a   :  { %620 = vsyncadd [#allocation4], 4294967280 }
 0x26b   :  { %499 = vsyncpa [#allocation4], 1 }

</bundles_post_ra>
